<compile_context>
chip_gen: v6e
topology: v6e:2x2x1
jax: 0.10.0
libtpu: 0.0.40
codegen_flags: <defaults>
</compile_context>

<pallas_src>
import functools

import jax
import jax.numpy as jnp
import numpy as np
from jax.experimental import pallas as pl
from jax.experimental.pallas import tpu as pltpu

_LANES = 128                            # vreg lane width
_BLOCK_ROWS = 4096                      # 4096 x 128 f32 = 2 MiB streaming block
_FUSED_LIMIT_ELEMS = 256 * 1024         # <= 1 MiB of f32: single-step fused kernel
_RESIDENT_LIMIT_ELEMS = 3 * 1024 * 1024 # <= 12 MiB of f32: VMEM-resident tier
_VMEM_LIMIT = 32 * 1024 * 1024          # safe on v5e/v6e (128 MiB) and v7x (64 MiB)
# TODO(synk): gate _RESIDENT_LIMIT_ELEMS / block sizes per generation via
# pltpu.get_tpu_info() instead of the conservative constants above.


def _cdiv(a, b):
    return -(-a // b)


def _round_up(a, b):
    return _cdiv(a, b) * b


# ---------------------------------------------------------------------------
# Shared accumulate helper: VPU-only (8,128) partial reductions of |x|
# ---------------------------------------------------------------------------
def _accumulate(acc_sum, acc_max, abs_x, block_rows):
    a3 = abs_x.reshape(block_rows // 8, 8, _LANES)
    acc_sum[...] = acc_sum[...] + jnp.sum(a3, axis=0)
    acc_max[...] = jnp.maximum(acc_max[...], jnp.max(a3, axis=0))


# ---------------------------------------------------------------------------
# Tier 1: fused single-step kernel (tiny weights, whole slab resident)
# ---------------------------------------------------------------------------
def _fused_kernel(x_ref, o_ref, *, n_total, wbit):
    x = x_ref[...].astype(jnp.float32)
    abs_x = jnp.abs(x)
    e = jnp.sum(abs_x) / jnp.float32(n_total)            # E = mean(|x|) (true count)
    # tanh odd & monotone -> max(|tanh(x)|) == tanh(max(|x|)); no tensor tanh here.
    max_w = jnp.tanh(jnp.max(abs_x))
    w = jnp.tanh(x)
    if wbit == 32:
        out = w * (e / max_w)
    else:
        n = float(2 ** wbit - 1)
        out = jnp.round((w * (0.5 / max_w) + 0.5) * n) * (2.0 * e / n) - e
    o_ref[...] = out.astype(o_ref.dtype)


# ---------------------------------------------------------------------------
# Tier 2: VMEM-resident single pass.
#   grid = (2, num_blocks); phase 0 streams blocks in (pipelined), accumulates
#   sum/max and parks each block in VMEM; phase 1 quantizes from the parked copy
#   and streams results out.  HBM traffic: 1 read + 1 write per element.
# ---------------------------------------------------------------------------
def _resident_kernel(x_ref, o_ref, park, acc_sum, acc_max, *,
                     block_rows, num_blocks, valid_rows, n_total, wbit):
    phase = pl.program_id(0)
    j = pl.program_id(1)
    mask_needed = (valid_rows % block_rows) != 0          # static Python bool

    @pl.when(jnp.logical_and(phase == 0, j == 0))
    def _():
        acc_sum[...] = jnp.zeros_like(acc_sum)
        acc_max[...] = jnp.zeros_like(acc_max)

    @pl.when(phase == 0)
    def _():
        x = x_ref[...]
        park[j] = x                                       # park for phase 1 (no re-read)
        abs_x = jnp.abs(x.astype(jnp.float32))
        if mask_needed:
            # Steady state: plain abs/add/max.  Masking only on the boundary block.
            @pl.when(j != num_blocks - 1)
            def _():
                _accumulate(acc_sum, acc_max, abs_x, block_rows)

            @pl.when(j == num_blocks - 1)
            def _():
                row = j * block_rows + jax.lax.broadcasted_iota(
                    jnp.int32, (block_rows, _LANES), 0)
                _accumulate(acc_sum, acc_max,
                            jnp.where(row < valid_rows, abs_x, 0.0), block_rows)
        else:
            _accumulate(acc_sum, acc_max, abs_x, block_rows)

    @pl.when(phase == 1)
    def _():
        # Tiny scalar combine recomputed per block (a single cross-lane reduce +
        # a few scalar ops; negligible next to the block's HBM writeback).
        e = jnp.sum(acc_sum[...]) / jnp.float32(n_total)
        max_w = jnp.tanh(jnp.max(acc_max[...]))
        w = jnp.tanh(park[j].astype(jnp.float32))
        if wbit == 32:
            out = w * (e / max_w)
        else:
            n = float(2 ** wbit - 1)
            out = jnp.round((w * (0.5 / max_w) + 0.5) * n) * (2.0 * e / n) - e
        # OOB rows of a partial block hold quantized garbage; Pallas clips the store.
        o_ref[...] = out.astype(o_ref.dtype)


# ---------------------------------------------------------------------------
# Tier 3a: streaming reduction pass (very large weights): sum(|x|), max(|x|)
# ---------------------------------------------------------------------------
def _reduce_kernel(x_ref, sum_ref, max_ref, acc_sum, acc_max, *,
                   block_rows, blocks_per_half, num_blocks, valid_rows):
    i = pl.program_id(0)          # half (parallel)
    j = pl.program_id(1)          # block within half (reduction)
    mask_needed = (valid_rows % block_rows) != 0          # static Python bool

    @pl.when(j == 0)
    def _():
        acc_sum[...] = jnp.zeros_like(acc_sum)
        acc_max[...] = jnp.zeros_like(acc_max)

    blk = i * blocks_per_half + j
    abs_x = jnp.abs(x_ref[...].astype(jnp.float32))

    if mask_needed:
        @pl.when(blk != num_blocks - 1)
        def _():
            _accumulate(acc_sum, acc_max, abs_x, block_rows)

        @pl.when(blk == num_blocks - 1)
        def _():
            row = blk * block_rows + jax.lax.broadcasted_iota(
                jnp.int32, (block_rows, _LANES), 0)
            _accumulate(acc_sum, acc_max,
                        jnp.where(row < valid_rows, abs_x, 0.0), block_rows)
    else:
        _accumulate(acc_sum, acc_max, abs_x, block_rows)

    @pl.when(j == blocks_per_half - 1)
    def _():
        sum_ref[...] = jnp.sum(acc_sum[...]).reshape(1, 1, 1)
        max_ref[...] = jnp.max(acc_max[...]).reshape(1, 1, 1)


# ---------------------------------------------------------------------------
# Tier 3b: streaming quantization pass; fma constants arrive via SMEM
# ---------------------------------------------------------------------------
def _quant_kernel(params_ref, x_ref, o_ref, *, wbit):
    w = jnp.tanh(x_ref[...].astype(jnp.float32))
    if wbit == 32:
        out = w * params_ref[0]                              # e / max_w
    else:
        n = float(2 ** wbit - 1)
        # params = [0.5/max_w, 2*e/n, -e]  -> tanh, fma, round, fma per element
        out = jnp.round((w * params_ref[0] + 0.5) * n) * params_ref[1] + params_ref[2]
    o_ref[...] = out.astype(o_ref.dtype)


# ---------------------------------------------------------------------------
# Wrapper
# ---------------------------------------------------------------------------
def weight_quantize_fn(x, bit_list, *,
                       fused_limit_elems=_FUSED_LIMIT_ELEMS,
                       resident_limit_elems=_RESIDENT_LIMIT_ELEMS,
                       block_rows=_BLOCK_ROWS,
                       mid_block_rows=None):
    wbit = int(bit_list[-1])
    assert wbit <= 8 or wbit == 32

    orig_shape = x.shape
    orig_dtype = x.dtype
    total = int(np.prod(orig_shape))

    # Flatten to a lane-dense 2-D slab (rows, 128).  No pad / no slice when the
    # element count is a multiple of 128 (the common conv-weight case).
    xf = x.reshape(-1)
    lane_pad = (-total) % _LANES
    if lane_pad:
        # TODO(synk): mask the <=127-element tail in-kernel instead of padding to
        # avoid the extra HBM round trip for large misaligned weights.
        xf = jnp.pad(xf, (0, lane_pad))
    rows = xf.size // _LANES
    x2 = xf.reshape(rows, _LANES)

    # NOTE: if the weight is identically zero, max(|tanh(x)|) == 0 and both this
    # kernel and the PyTorch reference divide by zero (matching semantics).

    if total <= fused_limit_elems:
        # ---- Tier 1: fused single-step path (tiny weights) ----
        out2 = pl.pallas_call(
            functools.partial(_fused_kernel, n_total=total, wbit=wbit),
            out_shape=jax.ShapeDtypeStruct((rows, _LANES), orig_dtype),
            grid=(1,),
            in_specs=[pl.BlockSpec((rows, _LANES), lambda i: (0, 0))],
            out_specs=pl.BlockSpec((rows, _LANES), lambda i: (0, 0)),
            compiler_params=pltpu.CompilerParams(
                dimension_semantics=("arbitrary",),
                vmem_limit_bytes=_VMEM_LIMIT),
        )(x2)

    elif total <= resident_limit_elems:
        # ---- Tier 2: VMEM-resident single pass (1 read + 1 write per element) ----
        if mid_block_rows is None:
            mbr = min(_BLOCK_ROWS,
                      max(256, _round_up(_cdiv(rows, 8), 8)),
                      _round_up(rows, 8))
        else:
            mbr = mid_block_rows
        assert mbr % 8 == 0
        nb = _cdiv(rows, mbr)

        # Phase 0 streams block j; phase 1 re-visits the last block (no re-fetch).
        in_spec = pl.BlockSpec(
            (mbr, _LANES), lambda i, j: ((1 - i) * j + i * (nb - 1), 0))
        # Phase 0 keeps the output index constant (no garbage writebacks); phase 1
        # writes block j.
        out_spec = pl.BlockSpec((mbr, _LANES), lambda i, j: (i * j, 0))

        out2 = pl.pallas_call(
            functools.partial(_resident_kernel, block_rows=mbr, num_blocks=nb,
                              valid_rows=rows, n_total=total, wbit=wbit),
            out_shape=jax.ShapeDtypeStruct((rows, _LANES), orig_dtype),
            grid=(2, nb),
            in_specs=[in_spec],
            out_specs=out_spec,
            scratch_shapes=[pltpu.VMEM((nb, mbr, _LANES), orig_dtype),   # parked blocks
                            pltpu.VMEM((8, _LANES), jnp.float32),        # sum partials
                            pltpu.VMEM((8, _LANES), jnp.float32)],       # max partials
            compiler_params=pltpu.CompilerParams(
                dimension_semantics=("arbitrary", "arbitrary"),
                vmem_limit_bytes=_VMEM_LIMIT),
        )(x2)

    else:
        # ---- Tier 3: two-pass streaming path with 2 MiB blocks ----
        br = min(block_rows, _round_up(rows, 8))
        assert br % 8 == 0
        num_blocks = _cdiv(rows, br)
        # 2-way split only when it divides evenly -> no clamped duplicate block.
        halves = 2 if (num_blocks % 2 == 0 and num_blocks >= 2) else 1
        blocks_per_half = num_blocks // halves
        # TODO(synk): verify the "parallel" half-axis actually shards across both
        # v7x TensorCores; switch to pltpu.CORE_PARALLEL if it does not.

        part_shape = jax.ShapeDtypeStruct((halves, 1, 1), jnp.float32)
        part_spec = pl.BlockSpec((1, 1, 1), lambda i, j: (i, 0, 0))

        sum_parts, max_parts = pl.pallas_call(
            functools.partial(_reduce_kernel, block_rows=br,
                              blocks_per_half=blocks_per_half,
                              num_blocks=num_blocks, valid_rows=rows),
            out_shape=(part_shape, part_shape),
            grid=(halves, blocks_per_half),
            in_specs=[pl.BlockSpec((br, _LANES),
                                   lambda i, j: (i * blocks_per_half + j, 0))],
            out_specs=(part_spec, part_spec),
            scratch_shapes=[pltpu.VMEM((8, _LANES), jnp.float32),
                            pltpu.VMEM((8, _LANES), jnp.float32)],
            compiler_params=pltpu.CompilerParams(
                dimension_semantics=("parallel", "arbitrary"),
                vmem_limit_bytes=_VMEM_LIMIT),
        )(x2)

        # Tiny scalar combine (f32 accumulation across blocks; rounding differs
        # slightly from a fused XLA mean -- well within the quantization tolerance).
        e = jnp.sum(sum_parts) / jnp.float32(total)
        max_w = jnp.tanh(jnp.max(max_parts))             # == max(|tanh(x)|)
        if wbit == 32:
            params = jnp.reshape(e / max_w, (1,)).astype(jnp.float32)
        else:
            n = float(2 ** wbit - 1)
            params = jnp.stack([0.5 / max_w, 2.0 * e / n, -e]).astype(jnp.float32)

        tile_spec = pl.BlockSpec((br, _LANES), lambda i: (i, 0))
        out2 = pl.pallas_call(
            functools.partial(_quant_kernel, wbit=wbit),
            out_shape=jax.ShapeDtypeStruct((rows, _LANES), orig_dtype),
            grid=(num_blocks,),
            in_specs=[pl.BlockSpec(memory_space=pltpu.MemorySpace.SMEM),
                      tile_spec],
            out_specs=tile_spec,
            compiler_params=pltpu.CompilerParams(
                dimension_semantics=("parallel",),
                vmem_limit_bytes=_VMEM_LIMIT),
        )(params, x2)

    if lane_pad:
        out = out2.reshape(-1)[:total]
        return out.reshape(orig_shape)
    return out2.reshape(orig_shape)


# ---------------------------------------------------------------------------
# Pure-JAX reference (mirrors the PyTorch forward)
# ---------------------------------------------------------------------------
def _reference(x, bit_list):
    wbit = bit_list[-1]
    x = x.astype(jnp.float32)
    e = jnp.mean(jnp.abs(x))
    w = jnp.tanh(x)
    if wbit == 32:
        return (w / jnp.max(jnp.abs(w))) * e
    n = float(2 ** wbit - 1)
    w = w / 2.0 / jnp.max(jnp.abs(w)) + 0.5
    return (2.0 * (jnp.round(w * n) / n) - 1.0) * e


def _check_quant(out, ref, e, wbit):
    """Quantized compare: fp-level match, tolerating rare one-level round-tie flips
    caused by ulp-level tanh differences between Mosaic and XLA."""
    n = float(2 ** wbit - 1)
    step = 2.0 * e / n
    diff = np.abs(out - ref)
    close = diff <= (1e-4 * np.abs(ref) + 1e-5)
    one_step = np.abs(diff - step) <= (1e-3 * step + 1e-5)
    assert np.all(close | one_step), "quantized output differs by more than one level"
    assert float(np.mean(~close)) < 1e-3, "too many round-tie mismatches"


if __name__ == "__main__":
    key = jax.random.PRNGKey(0)
    k1, k2, k3 = jax.random.split(key, 3)

    # 1) Tiny conv weight (OIHW), 128-aligned -> fused single-step path.
    x_small = jax.random.normal(k1, (8, 16, 3, 3), dtype=jnp.float32) * 0.1
    out8 = jax.block_until_ready(weight_quantize_fn(x_small, [2, 4, 8]))   # wbit = 8
    assert out8.shape == x_small.shape and out8.dtype == x_small.dtype
    _check_quant(np.asarray(out8), np.asarray(_reference(x_small, [2, 4, 8])),
                 e=float(jnp.mean(jnp.abs(x_small))), wbit=8)

    out32 = jax.block_until_ready(weight_quantize_fn(x_small, [32]))       # wbit = 32
    np.testing.assert_allclose(np.asarray(out32),
                               np.asarray(_reference(x_small, [32])),
                               rtol=1e-4, atol=1e-6)

    # 2) Misaligned element count (135) -> pad fallback inside the fused path.
    x_odd = jax.random.normal(k2, (3, 5, 3, 3), dtype=jnp.float32) * 0.2
    out_odd = jax.block_until_ready(weight_quantize_fn(x_odd, [8]))
    assert out_odd.shape == x_odd.shape
    _check_quant(np.asarray(out_odd), np.asarray(_reference(x_odd, [8])),
                 e=float(jnp.mean(jnp.abs(x_odd))), wbit=8)

    # 3) Medium conv weight forced down the VMEM-resident tier:
    #    multiple blocks + partial last block (nb=4, 24-row tail).
    x_med = jax.random.normal(k3, (16, 32, 6, 6), dtype=jnp.float32) * 0.1
    out4 = jax.block_until_ready(
        weight_quantize_fn(x_med, [2, 3, 4], fused_limit_elems=0,
                           mid_block_rows=40))                             # wbit = 4
    assert out4.shape == x_med.shape and out4.dtype == x_med.dtype
    _check_quant(np.asarray(out4), np.asarray(_reference(x_med, [2, 3, 4])),
                 e=float(jnp.mean(jnp.abs(x_med))), wbit=4)

    #    Resident tier again: single block (nb=1), full-precision branch.
    out32m = jax.block_until_ready(
        weight_quantize_fn(x_med, [32], fused_limit_elems=0))              # wbit = 32
    np.testing.assert_allclose(np.asarray(out32m),
                               np.asarray(_reference(x_med, [32])),
                               rtol=1e-4, atol=1e-6)

    # 4) Forced two-pass streaming path:
    #    even block count (2-way half split) with a partial last block ...
    out8b = jax.block_until_ready(
        weight_quantize_fn(x_med, [8], fused_limit_elems=0,
                           resident_limit_elems=0, block_rows=40))         # wbit = 8
    _check_quant(np.asarray(out8b), np.asarray(_reference(x_med, [8])),
                 e=float(jnp.mean(jnp.abs(x_med))), wbit=8)

    #    ... and odd block count (single half), exact blocks, 2-bit quantization.
    out2b = jax.block_until_ready(
        weight_quantize_fn(x_med, [2], fused_limit_elems=0,
                           resident_limit_elems=0, block_rows=48))         # wbit = 2
    _check_quant(np.asarray(out2b), np.asarray(_reference(x_med, [2])),
                 e=float(jnp.mean(jnp.abs(x_med))), wbit=2)

    print("KERNEL_OK")
</pallas_src>

<mosaic_0001>
module attributes {stable_mosaic.version = 11 : i64} {
  func.func @_fused_kernel(%arg0: i32, %arg1: memref<9x128xf32, #tpu.memory_space<vmem>>, %arg2: memref<9x128xf32, #tpu.memory_space<vmem>>) attributes {dimension_semantics = [#tpu.dimension_semantics<arbitrary>], iteration_bounds = array<i64: 1>, scalar_prefetch = 0 : i64, scratch_operands = 0 : i64, tpu.core_type = #tpu.core_type<tc>, window_params = [{pipeline_mode = #tpu.pipeline_mode<synchronous>, transform_indices = @transform_0, window_bounds = array<i64: 9, 128>}, {pipeline_mode = #tpu.pipeline_mode<synchronous>, transform_indices = @transform_1, window_bounds = array<i64: 9, 128>}]} {
    %c0 = arith.constant 0 : index
    %c0_0 = arith.constant 0 : index
    %0 = vector.load %arg1[%c0, %c0_0] : memref<9x128xf32, #tpu.memory_space<vmem>>, vector<9x128xf32>
    %1 = math.absf %0 : vector<9x128xf32>
    %2 = vector.shape_cast %1 : vector<9x128xf32> to vector<1x9x128xf32>
    %cst = arith.constant dense<0.000000e+00> : vector<1xf32>
    %3 = vector.multi_reduction <add>, %2, %cst [1, 2] : vector<1x9x128xf32> to vector<1xf32>
    %4 = vector.shape_cast %3 : vector<1xf32> to vector<1x1x1xf32>
    %5 = vector.extract %4[0, 0, 0] : f32 from vector<1x1x1xf32>
    %cst_1 = arith.constant 1.152000e+03 : f32
    %6 = arith.divf %5, %cst_1 : f32
    %7 = vector.shape_cast %1 : vector<9x128xf32> to vector<1x9x128xf32>
    %cst_2 = arith.constant dense<0xFF800000> : vector<1xf32>
    %8 = vector.multi_reduction <maximumf>, %7, %cst_2 [1, 2] : vector<1x9x128xf32> to vector<1xf32>
    %9 = vector.shape_cast %8 : vector<1xf32> to vector<1x1x1xf32>
    %10 = vector.extract %9[0, 0, 0] : f32 from vector<1x1x1xf32>
    %11 = math.tanh %10 : f32
    %12 = math.tanh %0 : vector<9x128xf32>
    %cst_3 = arith.constant 5.000000e-01 : f32
    %13 = arith.divf %cst_3, %11 : f32
    %14 = vector.broadcast %13 : f32 to vector<9x128xf32>
    %15 = arith.mulf %12, %14 : vector<9x128xf32>
    %cst_4 = arith.constant 5.000000e-01 : f32
    %16 = vector.broadcast %cst_4 : f32 to vector<9x128xf32>
    %17 = arith.addf %15, %16 : vector<9x128xf32>
    %cst_5 = arith.constant 2.550000e+02 : f32
    %18 = vector.broadcast %cst_5 : f32 to vector<9x128xf32>
    %19 = arith.mulf %17, %18 : vector<9x128xf32>
    %20 = math.roundeven %19 : vector<9x128xf32>
    %cst_6 = arith.constant 2.000000e+00 : f32
    %21 = arith.mulf %cst_6, %6 : f32
    %cst_7 = arith.constant 2.550000e+02 : f32
    %22 = arith.divf %21, %cst_7 : f32
    %23 = vector.broadcast %22 : f32 to vector<9x128xf32>
    %24 = arith.mulf %20, %23 : vector<9x128xf32>
    %25 = vector.broadcast %6 : f32 to vector<9x128xf32>
    %26 = arith.subf %24, %25 : vector<9x128xf32>
    %c0_8 = arith.constant 0 : index
    %c0_9 = arith.constant 0 : index
    %27 = vector.load %arg2[%c0_8, %c0_9] : memref<9x128xf32, #tpu.memory_space<vmem>>, vector<9x128xf32>
    tpu.vector_store %arg2[%c0_8, %c0_9], %26 {strides = array<i32>} : memref<9x128xf32, #tpu.memory_space<vmem>>, vector<9x128xf32>,
    return
  }
  func.func @transform_0(%arg0: i32) -> (i32, i32) {
    %c0_i32 = arith.constant 0 : i32
    %c0_i32_0 = arith.constant 0 : i32
    %c0_i32_1 = arith.constant 0 : i32
    return %c0_i32, %c0_i32_0 : i32, i32
  }
  func.func @transform_1(%arg0: i32) -> (i32, i32) {
    %c0_i32 = arith.constant 0 : i32
    %c0_i32_0 = arith.constant 0 : i32
    %c0_i32_1 = arith.constant 0 : i32
    return %c0_i32, %c0_i32_0 : i32, i32
  }
}

</mosaic_0001>

<bundles_post_ra>
// kernel: tpu_custom_call.1
= control target key start
LH: loop header
LB: loop body
LE: loop exit
PB: predicated region body
PF: predicated region fallthrough
CT: control target
= control target key end

     0   :  { %6 = vsyncpa [#allocation3], 0  ;;  %s209_s0 = inlined_call_operand.hbm [shape: f32[9,128], index: 0, kind: input, shape index: {}]   ;;  %s210_s1 = inlined_call_operand.hbm [shape: f32[9,128], index: 1, kind: output, shape index: {}]  }
   0x1   :  { %7 = vsyncpa [#allocation4], 0  ;;  %s180_s6 = smov [#allocation2]  }
   0x2   :  { %s13_s7 = sshll.u32 %s180_s6, 4  ;;  %s14_s7 = int_to_ptr.vmem [resolvable:$true] %s13_s7 }
   0x3   :  { %s144_s8 = scalar_lea.vmem %s14_s7, 256  ;;  %p149_p1 = scmp.lt.s32.totalorder %s14_s7, %s14_s7 }
   0x4   :  { %p145_p0 = scmp.ne.s32.totalorder %s14_s7, %s144_s8  ;;  %p150_p2 = scmp.lt.s32.totalorder %s144_s8, %s144_s8 }
   0x6   :  { %p151_p3 = por %p150_p2, %p149_p1 }
   0x8   :  { %p152_p4 = pnand %p151_p3, %p145_p0 }
   0xa   :  { %155 = shalt.err (!%p152_p4)
}
   0xb   :  { %s181_s9 = smov 128   ;;  %s182_s10 = smov 8  }
   0xc   :  { %19 = dma.hbm_to_vmem [thread:$0]  %s209_s0, 256, %s14_s7, [#allocation3], %s181_s9, %s181_s9, %s182_s10  }
   0xd   :  { %176 = dma.done.wait [#allocation3], 256  }
   0xe   :  { %177 = vsyncadd [#allocation3], 4294967040  ;;  %v23_v0 = vld [vmem:[#allocation2] sm:$0xff]  ;;  %v24_v1 = vld [vmem:[#allocation2 + $0x8] sm:$0x1]  ;;  %vm27_vm0 = vcmask 1040384  }
   0xf   :  { %v25_v2 = vand.u32 2147483647, %v23_v0  ;;  %v26_v3 = vand.u32 2147483647, %v24_v1  ;;  %s183_s20 = smov [#allocation5]  }
  0x10   :  { %s88_s21 = sshll.u32 %s183_s20, 4  ;;  %s89_s21 = int_to_ptr.vmem [resolvable:$true] %s88_s21 }
  0x11   :  { %v28_v4 = vsel %vm27_vm0, %v26_v3, 0.0  ;;  %v42_v5 = vsel %vm27_vm0, %v26_v3, -inf  ;;  %s156_s22 = scalar_lea.vmem %s89_s21, 256  ;;  %p161_p6 = scmp.lt.s32.totalorder %s89_s21, %s89_s21 }
  0x12   :  { %v29_v6 = vadd.f32 %v28_v4, %v25_v2  ;;  %v43_v7 = vmax.f32 %v25_v2, %v42_v5  ;;  %p157_p5 = scmp.ne.s32.totalorder %s89_s21, %s156_s22  ;;  %p162_p7 = scmp.lt.s32.totalorder %s156_s22, %s156_s22 }
  0x14   :  { %30 = vadd.xlane.f32.xlu0 %v29_v6  ;;  %p163_p8 = por %p162_p7, %p161_p6 }
  0x16   :  { %p164_p9 = pnand %p163_p8, %p157_p5 }
  0x18   :  { %44 = vmax.xlane.f32.xlu0 %v43_v7 }
  0x9d   :  { %v31_v8 = vpop.xlane.xlu0 %30 }
  0x9e   :  { %v32_v9 = vrot.slane %v31_v8, 4 }
  0xa0   :  { %v33_v10 = vadd.f32 %v32_v9, %v31_v8 }
  0xa1   :  { %v45_v11 = vpop.xlane.xlu0 %44 }
  0xa2   :  { %v34_v12 = vrot.slane %v33_v10, 2  ;;  %v46_v13 = vrot.slane %v45_v11, 4 }
  0xa4   :  { %v47_v14 = vmax.f32 %v45_v11, %v46_v13  ;;  %v35_v15 = vadd.f32 %v34_v12, %v33_v10 }
  0xa6   :  { %v48_v16 = vrot.slane %v47_v14, 2  ;;  %v36_v17 = vrot.slane %v35_v15, 1 }
  0xa8   :  { %v49_v18 = vmax.f32 %v47_v14, %v48_v16  ;;  %v37_v19 = vadd.f32 %v36_v17, %v35_v15 }
  0xaa   :  { %100 = vpush %v37_v19  ;;  %v50_v20 = vrot.slane %v49_v18, 1 }
  0xac   :  { %v51_v21 = vmax.f32 %v49_v18, %v50_v20 }
  0xae   :  { %102 = vpush %v51_v21 }
  0xdb   :  { %s200_s0 = spop %100 }
  0xdc   :  { %s41_s17 = smul.f32 0.00086805556, %s200_s0 }
  0xde   :  { %s71_s18 = smul.f32 2.0, %s41_s17  ;;  %v78_v51 = vstv %s41_s17 }
  0xdf   :  { %s103_s13 = spop %102 }
  0xe0   :  { %v53_v22 = vstv %s103_s13  ;;  %s74_s19 = smul.f32 0.003921569, %s71_s18 }
  0xe1   :  { %128 = vtanh.f32 %v53_v22 }
  0xe2   :  { %v75_v47 = vstv %s74_s19 }
  0xee   :  { %v129_v23 = vpop.eup %128 }
  0xef   :  { %104 = vpush %v129_v23 }
 0x120   :  { %s105_s14 = spop %104 }
 0x121   :  { %v58_v24 = vstv %s105_s14 }
 0x122   :  { %130 = vrcp.f32 %v58_v24 }
 0x123   :  { %132 = vtanh.f32 %v23_v0 }
 0x124   :  { %134 = vtanh.f32 %v24_v1 }
 0x12f   :  { %v131_v25 = vpop.eup %130 }
 0x130   :  { %106 = vpush %v131_v25  ;;  %v133_v26 = vpop.eup %132 }
 0x131   :  { %v135_v27 = vpop.eup %134 }
 0x161   :  { %s107_s15 = spop %106 }
 0x162   :  { %s61_s16 = smul.f32 0.5, %s107_s15 }
 0x164   :  { %v62_v28 = vstv %s61_s16 }
 0x165   :  { %v63_v29 = vmul.f32 %v133_v26, %v62_v28  ;;  %v64_v30 = vmul.f32 %v135_v27, %v62_v28 }
 0x167   :  { %v65_v31 = vadd.f32 0.5, %v63_v29  ;;  %v66_v32 = vadd.f32 0.5, %v64_v30 }
 0x169   :  { %v67_v33 = vmul.f32 255.0, %v65_v31  ;;  %v68_v34 = vmul.f32 255.0, %v66_v32 }
 0x16b   :  { %v110_v35 = vcvt.f32.s32 %v67_v33  ;;  %v118_v36 = vcvt.f32.s32 %v68_v34  ;;  %v108_v38 = vand.u32 2147483647, %v67_v33  ;;  %v113_v41 = vand.u32 2147483648, %v67_v33 }
 0x16c   :  { %v116_v42 = vand.u32 2147483647, %v68_v34  ;;  %v121_v44 = vand.u32 2147483648, %v68_v34 }
 0x16d   :  { %v111_v37 = vcvt.s32.f32 %v110_v35  ;;  %v119_v39 = vcvt.s32.f32 %v118_v36  ;;  %vm109_vm1 = vcmp.lt.f32.partialorder %v108_v38, 8388608.0 }
 0x16e   :  { %vm117_vm2 = vcmp.lt.f32.partialorder %v116_v42, 8388608.0 }
 0x16f   :  { %v112_v40 = vand.u32 2147483647, %v111_v37  ;;  %v120_v43 = vand.u32 2147483647, %v119_v39 }
 0x171   :  { %v114_v45 = vor.u32 %v113_v41, %v112_v40  ;;  %v122_v46 = vor.u32 %v121_v44, %v120_v43 }
 0x173   :  { %v115_v48 = vsel %vm109_vm1, %v114_v45, %v67_v33  ;;  %v123_v49 = vsel %vm117_vm2, %v122_v46, %v68_v34 }
 0x174   :  { %v76_v50 = vmul.f32 %v115_v48, %v75_v47  ;;  %v77_v52 = vmul.f32 %v123_v49, %v75_v47 }
 0x176   :  { %v79_v53 = vsub.f32 %v76_v50, %v78_v51  ;;  %v80_v54 = vsub.f32 %v77_v52, %v78_v51 }
 0x178   :  { %81 = vst [vmem:[#allocation5] sm:$0xff] %v79_v53  ;;  %82 = vst [vmem:[#allocation5 + $0x8] sm:$0x1] %v80_v54 }
 0x179   :  { %167 = shalt.err (!%p164_p9)
}
 0x17a   :  { %94 = dma.vmem_to_hbm [thread:$0]  %s89_s21, 256, %s210_s1, [#allocation4], %s181_s9, %s181_s9, %s182_s10  }
 0x17b   :  { %178 = dma.done.wait [#allocation4], 256  }
 0x17c   :  { %179 = vsyncadd [#allocation4], 4294967040 }
 0x17d   :  { %98 = vsyncpa [#allocation3], 1 }
 0x17e   :  { %99 = vsyncpa [#allocation4], 1 }

</bundles_post_ra>
